<compile_context>
chip_gen: v7x
topology: tpu7x:2x2x1
jax: 0.10.0
libtpu: 0.0.40
codegen_flags: <defaults>
</compile_context>

<pallas_src>
import jax
import jax.numpy as jnp
from jax import lax
from jax.experimental import pallas as pl
from jax.experimental.pallas import tpu as pltpu


# ----------------------------- glue: resizing ------------------------------ #
def _adaptive_avg_pool2d(x, oh, ow):
    # x: (N, C, H, W); matches torch.nn.functional.adaptive_avg_pool2d.
    N, C, H, W = x.shape
    if H % oh == 0 and W % ow == 0:
        # Fast path (used by the demo, 32 -> 16): one reshape + mean.
        return x.reshape(N, C, oh, H // oh, ow, W // ow).mean(axis=(3, 5))
    # General fallback: exact torch bin edges (rarely taken).
    rows = []
    for i in range(oh):
        h0 = (i * H) // oh
        h1 = -((-(i + 1) * H) // oh)
        cols = []
        for j in range(ow):
            w0 = (j * W) // ow
            w1 = -((-(j + 1) * W) // ow)
            cols.append(jnp.mean(x[:, :, h0:h1, w0:w1], axis=(2, 3)))
        rows.append(jnp.stack(cols, axis=-1))
    return jnp.stack(rows, axis=-2)


def _bilinear_align_corners(x, oh, ow):
    # x: (N, C, H, W); matches F.interpolate(mode='bilinear', align_corners=True).
    N, C, H, W = x.shape
    ys = jnp.linspace(0.0, H - 1.0, oh) if oh > 1 else jnp.zeros((oh,), jnp.float32)
    xs = jnp.linspace(0.0, W - 1.0, ow) if ow > 1 else jnp.zeros((ow,), jnp.float32)
    y0 = jnp.floor(ys).astype(jnp.int32)
    y1 = jnp.minimum(y0 + 1, H - 1)
    x0 = jnp.floor(xs).astype(jnp.int32)
    x1 = jnp.minimum(x0 + 1, W - 1)
    fy = (ys - y0.astype(jnp.float32))[None, None, :, None]
    fx = (xs - x0.astype(jnp.float32))[None, None, None, :]
    a = x[:, :, y0][:, :, :, x0]
    b = x[:, :, y0][:, :, :, x1]
    c = x[:, :, y1][:, :, :, x0]
    d = x[:, :, y1][:, :, :, x1]
    top = a * (1.0 - fx) + b * fx
    bot = c * (1.0 - fx) + d * fx
    return top * (1.0 - fy) + bot * fy


def _im2col_3x3(x):
    # x: (N, Cin, H, W) -> (N, 9*Cin, H*W) with contraction order (kh, kw, ci),
    # zero padding=1 (same as the Conv2d in the module).
    N, Cin, H, W = x.shape
    xp = jnp.pad(x, ((0, 0), (0, 0), (1, 1), (1, 1)))
    taps = []
    for kh in range(3):
        for kw in range(3):
            taps.append(xp[:, :, kh:kh + H, kw:kw + W])
    t = jnp.stack(taps, axis=1)               # (N, 9, Cin, H, W), tap = kh*3+kw
    return t.reshape(N, 9 * Cin, H * W)


# ------------------------------ Pallas kernel ------------------------------ #
def _make_msdi_kernel(S):
    def kernel(*refs):
        x_refs = refs[0:S]           # each: (K_pad_s, LW) bf16 -- stacked 9-tap operand
        w_refs = refs[S:2 * S]       # each: (Cout, K_pad_s) bf16
        b_refs = refs[2 * S:3 * S]   # each: (Cout, 1) f32
        o_ref = refs[3 * S]          # (Cout, LW) f32 -- lane-dense (LW multiple of 128)

        out = None
        for s in range(S):           # S is tiny; unrolled at trace time
            # One MXU dot per scale: (Cout, 9*Cin) @ (9*Cin, B_blk*HW), f32 acc.
            y = jnp.dot(w_refs[s][...], x_refs[s][...],
                        preferred_element_type=jnp.float32)
            y = y + b_refs[s][...]                    # bias broadcast over lanes
            out = y if out is None else out * y       # ans = ans * convs[i](x_i)
        o_ref[...] = out.astype(o_ref.dtype)

    return kernel


def msdi_forward(xs, weights, biases):
    # xs: list of NCHW arrays; weights[i]: (Cout, Cin_i, 3, 3); biases[i]: (Cout,)
    S = len(xs)
    N = xs[1].shape[0]
    TH, TW = xs[1].shape[-2], xs[1].shape[-1]
    HW = TH * TW
    Cout = weights[0].shape[0]

    # Batch folding: G grid steps, B_blk batch elems concatenated on the lane axis.
    # G = 2 keeps both v7x TensorCores busy; costs at most one extra step on v5e/v6e.
    G = min(N, 2)
    B_blk = -(-N // G)           # ceil
    N_pad = G * B_blk
    LW = B_blk * HW

    x_in, w_in, b_in, k_pads, k_real = [], [], [], [], []
    for x, w, b in zip(xs, weights, biases):
        # Same (square-assuming) dispatch rule as the PyTorch module:
        # compares x.shape[-1] against target_size[0].
        if x.shape[-1] > TH:
            x = _adaptive_avg_pool2d(x, TH, TW)
        elif x.shape[-1] < TH:
            x = _bilinear_align_corners(x, TH, TW)
        Cin = x.shape[1]
        K = 9 * Cin
        K_pad = ((K + 15) // 16) * 16        # bf16 sublane pack alignment

        xcol = _im2col_3x3(x)                                   # (N, 9*Cin, HW) f32
        if N_pad > N:
            xcol = jnp.pad(xcol, ((0, N_pad - N), (0, 0), (0, 0)))
        xcol = jnp.pad(xcol, ((0, 0), (0, K_pad - K), (0, 0)))  # zero contraction pad
        # Fold B_blk batch elements onto the lane axis: (G, K_pad, B_blk*HW).
        xcol = (xcol.reshape(G, B_blk, K_pad, HW)
                     .transpose(0, 2, 1, 3)
                     .reshape(G, K_pad, LW))
        x_in.append(xcol.astype(jnp.bfloat16))

        # (Cout, Cin, 3, 3) -> (Cout, kh, kw, ci) -> (Cout, 9*Cin), zero-padded to K_pad.
        wm = jnp.transpose(w, (0, 2, 3, 1)).reshape(Cout, K)
        wm = jnp.pad(wm, ((0, 0), (0, K_pad - K)))
        w_in.append(wm.astype(jnp.bfloat16))

        b_in.append(b.reshape(Cout, 1).astype(jnp.float32))
        k_pads.append(K_pad)
        k_real.append(K)

    in_specs = (
        [pl.BlockSpec((None, kp, LW), lambda g: (g, 0, 0)) for kp in k_pads]
        + [pl.BlockSpec((Cout, kp), lambda g: (0, 0)) for kp in k_pads]
        + [pl.BlockSpec((Cout, 1), lambda g: (0, 0)) for _ in k_pads]
    )

    flops = sum(2 * N * HW * Cout * k for k in k_real) + N * HW * Cout * (2 * S - 1)
    bytes_accessed = (sum(N_pad * kp * HW * 2 + Cout * kp * 2 + Cout * 4 for kp in k_pads)
                      + N_pad * Cout * HW * 4)

    out = pl.pallas_call(
        _make_msdi_kernel(S),
        out_shape=jax.ShapeDtypeStruct((G, Cout, LW), jnp.float32),
        grid=(G,),
        in_specs=in_specs,
        out_specs=pl.BlockSpec((None, Cout, LW), lambda g: (g, 0, 0)),
        compiler_params=pltpu.CompilerParams(dimension_semantics=("parallel",)),
        cost_estimate=pl.CostEstimate(flops=flops, transcendentals=0,
                                      bytes_accessed=bytes_accessed),
    )(*x_in, *w_in, *b_in)

    # (G, Cout, B_blk*HW) -> (N, Cout, TH, TW)
    out = out.reshape(G, Cout, B_blk, TH, TW).transpose(0, 2, 1, 3, 4)
    return out.reshape(N_pad, Cout, TH, TW)[:N]


# ---------------------------- pure-JAX reference --------------------------- #
def msdi_reference(xs, weights, biases, operand_dtype=jnp.float32):
    # operand_dtype lets the test reproduce the kernel's bf16 operand rounding.
    N = xs[1].shape[0]
    TH, TW = xs[1].shape[-2], xs[1].shape[-1]
    Cout = weights[0].shape[0]
    ans = jnp.ones((N, Cout, TH, TW), jnp.float32)
    for x, w, b in zip(xs, weights, biases):
        if x.shape[-1] > TH:
            x = _adaptive_avg_pool2d(x, TH, TW)
        elif x.shape[-1] < TH:
            x = _bilinear_align_corners(x, TH, TW)
        x = x.astype(operand_dtype).astype(jnp.float32)
        w = w.astype(operand_dtype).astype(jnp.float32)
        y = lax.conv_general_dilated(
            x, w, window_strides=(1, 1), padding=((1, 1), (1, 1)),
            dimension_numbers=("NCHW", "OIHW", "NCHW"))
        ans = ans * (y + b[None, :, None, None])
    return ans


if __name__ == "__main__":
    key = jax.random.PRNGKey(0)
    channel = [4, 8, 16]          # channel[i] = in-channels of scale i
    Cout = channel[1]             # every conv maps to channel[1] outputs
    N = 2
    sizes = [32, 16, 8]           # larger / target / smaller spatial sizes

    keys = iter(jax.random.split(key, 3 * len(channel)))
    xs, weights, biases = [], [], []
    for c, s in zip(channel, sizes):
        xs.append(jax.random.normal(next(keys), (N, c, s, s), jnp.float32))
    for c in channel:
        bound = 1.0 / ((c * 9) ** 0.5)
        weights.append(jax.random.uniform(next(keys), (Cout, c, 3, 3),
                                          jnp.float32, -bound, bound))
        biases.append(jax.random.uniform(next(keys), (Cout,),
                                         jnp.float32, -bound, bound))

    out = jax.block_until_ready(msdi_forward(xs, weights, biases))
    ref_f32 = jax.block_until_ready(msdi_reference(xs, weights, biases))
    ref_bf16 = jax.block_until_ready(
        msdi_reference(xs, weights, biases, operand_dtype=jnp.bfloat16))

    assert out.shape == ref_f32.shape == (N, Cout, 16, 16), (out.shape, ref_f32.shape)
    # Tight check vs a reference using the same bf16 operand rounding (isolates
    # kernel math), plus a loose sanity check vs the pure-f32 module semantics.
    err_q = float(jnp.max(jnp.abs(out - ref_bf16)))
    err_f = float(jnp.max(jnp.abs(out - ref_f32)))
    assert jnp.allclose(out, ref_bf16, rtol=2e-3, atol=2e-3), err_q
    assert jnp.allclose(out, ref_f32, rtol=5e-2, atol=5e-2), err_f
    print("KERNEL_OK")
</pallas_src>

<mosaic_0001>
module attributes {stable_mosaic.version = 11 : i64} {
  func.func @kernel(%arg0: i32, %arg1: memref<1x48x256xbf16, #tpu.memory_space<vmem>>, %arg2: memref<1x80x256xbf16, #tpu.memory_space<vmem>>, %arg3: memref<1x144x256xbf16, #tpu.memory_space<vmem>>, %arg4: memref<8x48xbf16, #tpu.memory_space<vmem>>, %arg5: memref<8x80xbf16, #tpu.memory_space<vmem>>, %arg6: memref<8x144xbf16, #tpu.memory_space<vmem>>, %arg7: memref<8x1xf32, #tpu.memory_space<vmem>>, %arg8: memref<8x1xf32, #tpu.memory_space<vmem>>, %arg9: memref<8x1xf32, #tpu.memory_space<vmem>>, %arg10: memref<1x8x256xf32, #tpu.memory_space<vmem>>) attributes {dimension_semantics = [#tpu.dimension_semantics<parallel>], iteration_bounds = array<i64: 2>, scalar_prefetch = 0 : i64, scratch_operands = 0 : i64, tpu.core_type = #tpu.core_type<tc>, window_params = [{transform_indices = @transform_0, window_bounds = array<i64: 1, 48, 256>}, {transform_indices = @transform_1, window_bounds = array<i64: 1, 80, 256>}, {transform_indices = @transform_2, window_bounds = array<i64: 1, 144, 256>}, {pipeline_mode = #tpu.pipeline_mode<synchronous>, transform_indices = @transform_3, window_bounds = array<i64: 8, 48>}, {pipeline_mode = #tpu.pipeline_mode<synchronous>, transform_indices = @transform_4, window_bounds = array<i64: 8, 80>}, {pipeline_mode = #tpu.pipeline_mode<synchronous>, transform_indices = @transform_5, window_bounds = array<i64: 8, 144>}, {pipeline_mode = #tpu.pipeline_mode<synchronous>, transform_indices = @transform_6, window_bounds = array<i64: 8, 1>}, {pipeline_mode = #tpu.pipeline_mode<synchronous>, transform_indices = @transform_7, window_bounds = array<i64: 8, 1>}, {pipeline_mode = #tpu.pipeline_mode<synchronous>, transform_indices = @transform_8, window_bounds = array<i64: 8, 1>}, {transform_indices = @transform_9, window_bounds = array<i64: 1, 8, 256>}]} {
    %c0 = arith.constant 0 : index
    %c0_0 = arith.constant 0 : index
    %0 = vector.load %arg4[%c0, %c0_0] : memref<8x48xbf16, #tpu.memory_space<vmem>>, vector<8x48xbf16>
    %c0_1 = arith.constant 0 : index
    %c0_2 = arith.constant 0 : index
    %c0_3 = arith.constant 0 : index
    %1 = vector.load %arg1[%c0_1, %c0_2, %c0_3] : memref<1x48x256xbf16, #tpu.memory_space<vmem>>, vector<1x48x256xbf16>
    %2 = vector.shape_cast %1 : vector<1x48x256xbf16> to vector<48x256xbf16>
    %cst = arith.constant dense<0.000000e+00> : vector<8x256xf32>
    %3 = tpu.matmul %0, %2, %cst {dimension_numbers = #tpu.dot_dimension_numbers<[1], [0], [0], [1], [0, 0, 1, 1], [], []>} : vector<8x48xbf16>, vector<48x256xbf16>, vector<8x256xf32> -> vector<8x256xf32>
    %c0_4 = arith.constant 0 : index
    %c0_5 = arith.constant 0 : index
    %4 = vector.load %arg7[%c0_4, %c0_5] : memref<8x1xf32, #tpu.memory_space<vmem>>, vector<8x1xf32>
    %5 = vector.broadcast %4 : vector<8x1xf32> to vector<8x256xf32>
    %6 = arith.addf %3, %5 : vector<8x256xf32>
    %c0_6 = arith.constant 0 : index
    %c0_7 = arith.constant 0 : index
    %7 = vector.load %arg5[%c0_6, %c0_7] : memref<8x80xbf16, #tpu.memory_space<vmem>>, vector<8x80xbf16>
    %c0_8 = arith.constant 0 : index
    %c0_9 = arith.constant 0 : index
    %c0_10 = arith.constant 0 : index
    %8 = vector.load %arg2[%c0_8, %c0_9, %c0_10] : memref<1x80x256xbf16, #tpu.memory_space<vmem>>, vector<1x80x256xbf16>
    %9 = vector.shape_cast %8 : vector<1x80x256xbf16> to vector<80x256xbf16>
    %cst_11 = arith.constant dense<0.000000e+00> : vector<8x256xf32>
    %10 = tpu.matmul %7, %9, %cst_11 {dimension_numbers = #tpu.dot_dimension_numbers<[1], [0], [0], [1], [0, 0, 1, 1], [], []>} : vector<8x80xbf16>, vector<80x256xbf16>, vector<8x256xf32> -> vector<8x256xf32>
    %c0_12 = arith.constant 0 : index
    %c0_13 = arith.constant 0 : index
    %11 = vector.load %arg8[%c0_12, %c0_13] : memref<8x1xf32, #tpu.memory_space<vmem>>, vector<8x1xf32>
    %12 = vector.broadcast %11 : vector<8x1xf32> to vector<8x256xf32>
    %13 = arith.addf %10, %12 : vector<8x256xf32>
    %14 = arith.mulf %6, %13 : vector<8x256xf32>
    %c0_14 = arith.constant 0 : index
    %c0_15 = arith.constant 0 : index
    %15 = vector.load %arg6[%c0_14, %c0_15] : memref<8x144xbf16, #tpu.memory_space<vmem>>, vector<8x144xbf16>
    %c0_16 = arith.constant 0 : index
    %c0_17 = arith.constant 0 : index
    %c0_18 = arith.constant 0 : index
    %16 = vector.load %arg3[%c0_16, %c0_17, %c0_18] : memref<1x144x256xbf16, #tpu.memory_space<vmem>>, vector<1x144x256xbf16>
    %17 = vector.shape_cast %16 : vector<1x144x256xbf16> to vector<144x256xbf16>
    %cst_19 = arith.constant dense<0.000000e+00> : vector<8x256xf32>
    %18 = tpu.matmul %15, %17, %cst_19 {dimension_numbers = #tpu.dot_dimension_numbers<[1], [0], [0], [1], [0, 0, 1, 1], [], []>} : vector<8x144xbf16>, vector<144x256xbf16>, vector<8x256xf32> -> vector<8x256xf32>
    %c0_20 = arith.constant 0 : index
    %c0_21 = arith.constant 0 : index
    %19 = vector.load %arg9[%c0_20, %c0_21] : memref<8x1xf32, #tpu.memory_space<vmem>>, vector<8x1xf32>
    %20 = vector.broadcast %19 : vector<8x1xf32> to vector<8x256xf32>
    %21 = arith.addf %18, %20 : vector<8x256xf32>
    %22 = arith.mulf %14, %21 : vector<8x256xf32>
    %c0_22 = arith.constant 0 : index
    %c0_23 = arith.constant 0 : index
    %c0_24 = arith.constant 0 : index
    %23 = vector.load %arg10[%c0_22, %c0_23, %c0_24] : memref<1x8x256xf32, #tpu.memory_space<vmem>>, vector<1x8x256xf32>
    %24 = vector.shape_cast %23 : vector<1x8x256xf32> to vector<8x256xf32>
    %25 = vector.shape_cast %22 : vector<8x256xf32> to vector<1x8x256xf32>
    tpu.vector_store %arg10[%c0_22, %c0_23, %c0_24], %25 {strides = array<i32>} : memref<1x8x256xf32, #tpu.memory_space<vmem>>, vector<1x8x256xf32>,
    return
  }
  func.func @transform_0(%arg0: i32) -> (i32, i32, i32) {
    %c0_i32 = arith.constant 0 : i32
    %c0_i32_0 = arith.constant 0 : i32
    %c0_i32_1 = arith.constant 0 : i32
    return %arg0, %c0_i32, %c0_i32_0 : i32, i32, i32
  }
  func.func @transform_1(%arg0: i32) -> (i32, i32, i32) {
    %c0_i32 = arith.constant 0 : i32
    %c0_i32_0 = arith.constant 0 : i32
    %c0_i32_1 = arith.constant 0 : i32
    return %arg0, %c0_i32, %c0_i32_0 : i32, i32, i32
  }
  func.func @transform_2(%arg0: i32) -> (i32, i32, i32) {
    %c0_i32 = arith.constant 0 : i32
    %c0_i32_0 = arith.constant 0 : i32
    %c0_i32_1 = arith.constant 0 : i32
    return %arg0, %c0_i32, %c0_i32_0 : i32, i32, i32
  }
  func.func @transform_3(%arg0: i32) -> (i32, i32) {
    %c0_i32 = arith.constant 0 : i32
    %c0_i32_0 = arith.constant 0 : i32
    %c0_i32_1 = arith.constant 0 : i32
    return %c0_i32, %c0_i32_0 : i32, i32
  }
  func.func @transform_4(%arg0: i32) -> (i32, i32) {
    %c0_i32 = arith.constant 0 : i32
    %c0_i32_0 = arith.constant 0 : i32
    %c0_i32_1 = arith.constant 0 : i32
    return %c0_i32, %c0_i32_0 : i32, i32
  }
  func.func @transform_5(%arg0: i32) -> (i32, i32) {
    %c0_i32 = arith.constant 0 : i32
    %c0_i32_0 = arith.constant 0 : i32
    %c0_i32_1 = arith.constant 0 : i32
    return %c0_i32, %c0_i32_0 : i32, i32
  }
  func.func @transform_6(%arg0: i32) -> (i32, i32) {
    %c0_i32 = arith.constant 0 : i32
    %c0_i32_0 = arith.constant 0 : i32
    %c0_i32_1 = arith.constant 0 : i32
    return %c0_i32, %c0_i32_0 : i32, i32
  }
  func.func @transform_7(%arg0: i32) -> (i32, i32) {
    %c0_i32 = arith.constant 0 : i32
    %c0_i32_0 = arith.constant 0 : i32
    %c0_i32_1 = arith.constant 0 : i32
    return %c0_i32, %c0_i32_0 : i32, i32
  }
  func.func @transform_8(%arg0: i32) -> (i32, i32) {
    %c0_i32 = arith.constant 0 : i32
    %c0_i32_0 = arith.constant 0 : i32
    %c0_i32_1 = arith.constant 0 : i32
    return %c0_i32, %c0_i32_0 : i32, i32
  }
  func.func @transform_9(%arg0: i32) -> (i32, i32, i32) {
    %c0_i32 = arith.constant 0 : i32
    %c0_i32_0 = arith.constant 0 : i32
    %c0_i32_1 = arith.constant 0 : i32
    return %arg0, %c0_i32, %c0_i32_0 : i32, i32, i32
  }
}

</mosaic_0001>

<bundles_post_ra>
// kernel: tpu_custom_call.1
= control target key start
LH: loop header
LB: loop body
LE: loop exit
PB: predicated region body
PF: predicated region fallthrough
CT: control target
= control target key end

     0   :  { %s1631_s0 = inlined_call_operand.hbm [shape: bf16[2,48,256], index: 0, kind: input, shape index: {}]   ;;  %s1632_s1 = inlined_call_operand.hbm [shape: bf16[2,80,256], index: 1, kind: input, shape index: {}]   ;;  %s1633_s2 = inlined_call_operand.hbm [shape: bf16[2,144,256], index: 2, kind: input, shape index: {}]   ;;  %s1634_s3 = inlined_call_operand.vmem [shape: bf16[8,48], index: 3, kind: input, shape index: {}]   ;;  %s1635_s4 = inlined_call_operand.vmem [shape: bf16[8,80], index: 4, kind: input, shape index: {}]   ;;  %s1636_s5 = inlined_call_operand.vmem [shape: bf16[8,144], index: 5, kind: input, shape index: {}]   ;;  %s1637_s6 = inlined_call_operand.vmem [shape: f32[8,1], index: 6, kind: input, shape index: {}]   ;;  %s1638_s7 = inlined_call_operand.vmem [shape: f32[8,1], index: 7, kind: input, shape index: {}]   ;;  %s1639_s8 = inlined_call_operand.vmem [shape: f32[8,1], index: 8, kind: input, shape index: {}]   ;;  %s1640_s9 = inlined_call_operand.hbm [shape: f32[2,8,256], index: 9, kind: output, shape index: {}]  }
   0x1   :  { %1651 = sst [smem:[#allocation18_spill]] %s1632_s1 }
   0x2   :  { %1652 = sst [smem:[#allocation19_spill]] %s1640_s9 }
   0x3   :  { %14 = vsyncpa [#allocation3], 0 }
   0x4   :  { %16 = vsyncpa [#allocation3 + $0x1], 0 }
   0x5   :  { %17 = vsyncpa [#allocation6], 0 }
   0x6   :  { %19 = vsyncpa [#allocation6 + $0x1], 0 }
   0x7   :  { %20 = vsyncpa [#allocation4], 0 }
   0x8   :  { %22 = vsyncpa [#allocation4 + $0x1], 0  ;;  %s1324_s30 = smov 0   ;;  %s1326_s10 = smov 0  }
   0x9   :  { %s1328_s11 = smov 0   ;;  %s1330_s12 = smov 0  }
   0xa LB: > { %1653 = sst [smem:[#allocation12_spill]] %s1253_s30  ;;  %s1345_s13 = sadd.s32 4294967295, %s1265_s12   ;;  %s1265_s12 = sphi %s1330_s12, %s1675_s12   ;;  %s1261_s11 = sphi %s1328_s11, %s1677_s11   ;;  %s1257_s10 = sphi %s1326_s10, %s1679_s10   ;;  %s1253_s30 = sphi %s1324_s30, %s1678_s30  }
   0xb   : > { %1654 = sst [smem:[#allocation13_spill]] %s1261_s11  ;;  %s929_s14 = sadd.s32 4294967294, %s1265_s12  }
   0xc   : > { %s1349_s15 = sadd.s32 1, %s1265_s12   ;;  %s35_s16 = sadd.s32 1, %s1261_s11 }
   0xd   : > { %1655 = sst [smem:[#allocation14_spill]] %s1349_s15  ;;  %s32_s17 = ssub.s32 %s1265_s12, %s1349_s15 }
   0xe   : > { %p42_p0 = scmp.ne.s32.totalorder %s1261_s11, %s1257_s10  ;;  %p33_p1 = scmp.eq.s32.totalorder %s32_s17, 0 }
   0xf   : > { %p43_p2 = scmp.eq.s32.totalorder %s1265_s12, 0  ;;  %p48_p3 = scmp.ne.s32.totalorder %s1257_s10, %s1253_s30 }
  0x10   : > { %p49_p4 = scmp.eq.s32.totalorder %s1345_s13, 0  ;;  %p250_p7 = scmp.eq.s32.totalorder %s1345_s13, 1 }
  0x11   : > { %s1361_s18 = scalar_select %p33_p1, %s1261_s11, %s35_s16  }
  0x12   : > { %p44_p5 = por %p43_p2, %p42_p0  ;;  %p1363_p6 = por %p49_p4, %p48_p3 }
  0x13   : > { %1656 = sst [smem:[#allocation15_spill]] %s1361_s18  ;;  %p256_p8 = scmp.eq.s32.totalorder %s929_s14, 1 }
  0x14   : > { %s1657_s19 = scalar_select %p1363_p6, 1, 0 }
  0x15   : > { %p1013_p10 = scmp.lt.s32.totalorder %s1265_s12, 2  ;;  %p1370_p11 = por %p250_p7, %p42_p0 }
  0x16   : > { %p1374_p12 = por %p256_p8, %p48_p3  ;;  %s1379_s22 = sand.u32 1, %s1261_s11  }
  0x17   : > { %s1658_s20 = scalar_select %p1370_p11, 1, 0 }
  0x18   : > { %s1660_s21 = scalar_select %p1374_p12, 1, 0 }
  0x19   : > { %1659 = sst [smem:[#allocation16_spill]] %s1658_s20  ;;  %p1381_p13 = pnand %p1013_p10, %p44_p5 }
  0x1a   : > { %1661 = sst [smem:[#allocation17_spill]] %s1660_s21  ;;  %s315_s24 = sand.u32 1, %s1265_s12  }
  0x1b   : > { %s984_s25 = smul.u32 80, %s1379_s22  ;;  %p935_p1 = scmp.ge.s32.totalorder %s1265_s12, 1 }
  0x1c   : > { %s985_s26 = smul.u32 1280, %s1265_s12  ;;  %p355_p0 = scmp.lt.s32.totalorder %s1265_s12, 3 }
  0x1d   : > { %s1663_s1 = sld [smem:[#allocation18_spill]]  ;;  %s319_s14 = scalar_lea.vmem [#allocation5], %s984_s25 }
  0x1e   : > { %s326_s16 = sshll.u32 %s319_s14, 4  ;;  %p1397_p2 = pnand %p935_p1, %p355_p0  ;;  %s1395_s16 = int_to_ptr.vmem [resolvable:$true] %s326_s16 }
  0x1f   : > { %s1401_s18 = scalar_lea.sflag [#allocation6], %s315_s24  ;;  %p1407_p4 = pneg %p1381_p13 }
  0x20   : > { %s1664_s17 = scalar_select %p1397_p2, 1, 0 }
  0x23   : > { %s1393_s29 = scalar_lea.hbm %s1663_s1, %s985_s26  ;;  %s1110_s28 = scalar_lea.hbm %s1663_s1, 2560 }
  0x24   : > { %s1105_s11 = scalar_lea.hbm %s1393_s29, 1280  ;;  %p1111_p8 = scmp.lt.u32.totalorder %s1393_s29, %s1663_s1 }
  0x25   : > { %p1106_p3 = scmp.ne.s32.totalorder %s1393_s29, %s1105_s11  ;;  %p1112_p10 = scmp.lt.u32.totalorder %s1110_s28, %s1105_s11 }
  0x26   : > { %p1114_p0 = scmp.lt.u32.totalorder %s1105_s11, %s1393_s29 }
  0x27   : > { %p1108_p5 = pnand %p1407_p4, %p1106_p3  ;;  %p1113_p1 = por %p1112_p10, %p1111_p8 }
  0x29   : > { %p1109_p7 = pneg %p1108_p5  ;;  %p1115_p9 = por %p1114_p0, %p1113_p1 }
  0x2b   : > { %p1116_p12 = pnand %p1115_p9, %p1109_p7 }
  0x2d   : > { %1119 = shalt.err (!%p1116_p12)
}
  0x2e   : > { %s1120_s24 = scalar_lea.vmem %s1395_s16, 1280  ;;  %s1267_s25 = smov [#allocation5]  }
  0x2f   : > { %p1121_p3 = scmp.ne.s32.totalorder %s1395_s16, %s1120_s24  ;;  %s1125_s27 = sshll.u32 %s1267_s25, 4  ;;  %s1126_s27 = int_to_ptr.vmem [resolvable:$false] %s1125_s27 }
  0x30   : > { %s1127_s15 = scalar_lea.vmem %s1126_s27, 2560  ;;  %p1128_p6 = scmp.lt.s32.totalorder %s1395_s16, %s1126_s27 }
  0x31   : > { %p1123_p5 = pnand %p1121_p3, %p1407_p4  ;;  %p1129_p2 = scmp.lt.s32.totalorder %s1127_s15, %s1120_s24 }
  0x33   : > { %p1124_p11 = pneg %p1123_p5  ;;  %p1130_p8 = por %p1129_p2, %p1128_p6 }
  0x35   : > { %p1131_p10 = pnand %p1130_p8, %p1124_p11 }
  0x37   : > { %1134 = shalt.err (!%p1131_p10)
}
  0x38   : > { %s1268_s11 = smov 128   ;;  %s1269_s28 = smov 8  }
  0x39   : > { %1005 = dma.hbm_to_vmem [thread:$0]  (!%p1381_p13), %s1393_s29, 1280, %s1395_s16, %s1401_s18, %s1268_s11, %s1268_s11, %s1269_s28  }
  0x3a   : > { %s982_s14 = smul.u32 48, %s1379_s22  ;;  %s295_s9 = scalar_lea.sflag [#allocation3], %s1379_s22 }
  0x3b   : > { %s983_s24 = smul.u32 768, %s1265_s12  ;;  %s1140_s27 = scalar_lea.hbm %s1631_s0, 1536 }
  0x3c   : > { %s986_s25 = smul.u32 144, %s1379_s22  ;;  %s298_s21 = scalar_lea.vmem [#allocation2], %s982_s14 }
  0x3d   : > { %s1440_s1 = scalar_lea.hbm %s1631_s0, %s983_s24  ;;  %s305_s30 = sshll.u32 %s298_s21, 4  ;;  %s1442_s30 = int_to_ptr.vmem [resolvable:$true] %s305_s30 }
  0x3e   : > { %s1135_s20 = scalar_lea.hbm %s1440_s1, 768  ;;  %p1141_p12 = scmp.lt.u32.totalorder %s1440_s1, %s1631_s0 }
  0x3f   : > { %p1136_p6 = scmp.ne.s32.totalorder %s1440_s1, %s1135_s20  ;;  %p1142_p2 = scmp.lt.u32.totalorder %s1140_s27, %s1135_s20 }
  0x40   : > { %p1144_p1 = scmp.lt.u32.totalorder %s1135_s20, %s1440_s1 }
  0x41   : > { %p1138_p9 = pnand %p1136_p6, %p1407_p4  ;;  %p1143_p7 = por %p1142_p2, %p1141_p12 }
  0x43   : > { %p1139_p11 = pneg %p1138_p9  ;;  %p1145_p0 = por %p1144_p1, %p1143_p7 }
  0x45   : > { %p1146_p3 = pnand %p1145_p0, %p1139_p11 }
  0x47   : > { %1149 = shalt.err (!%p1146_p3)
}
  0x48   : > { %s1150_s21 = scalar_lea.vmem %s1442_s30, 768  ;;  %s1270_s14 = smov [#allocation2]  }
  0x49   : > { %p1151_p5 = scmp.ne.s32.totalorder %s1442_s30, %s1150_s21  ;;  %s1155_s29 = sshll.u32 %s1270_s14, 4  ;;  %s1156_s29 = int_to_ptr.vmem [resolvable:$false] %s1155_s29 }
  0x4a   : > { %s1157_s16 = scalar_lea.vmem %s1156_s29, 1536  ;;  %p1158_p6 = scmp.lt.s32.totalorder %s1442_s30, %s1156_s29 }
  0x4b   : > { %p1153_p8 = pnand %p1151_p5, %p1407_p4  ;;  %p1159_p9 = scmp.lt.s32.totalorder %s1157_s16, %s1150_s21 }
  0x4d   : > { %p1154_p10 = pneg %p1153_p8  ;;  %p1160_p12 = por %p1159_p9, %p1158_p6 }
  0x4f   : > { %p1161_p2 = pnand %p1160_p12, %p1154_p10 }
  0x51   : > { %1164 = shalt.err (!%p1161_p2)
}
  0x52   : > { %1002 = dma.hbm_to_vmem [thread:$0]  (!%p1381_p13), %s1440_s1, 768, %s1442_s30, %s295_s9, %s1268_s11, %s1268_s11, %s1269_s28  }
  0x53   : > { %s987_s20 = smul.u32 2304, %s1265_s12  ;;  %s340_s27 = scalar_lea.vmem [#allocation7], %s986_s25 }
  0x54   : > { %s347_s24 = sshll.u32 %s340_s27, 4  ;;  %s1170_s30 = scalar_lea.hbm %s1633_s2, 4608  ;;  %s1474_s24 = int_to_ptr.vmem [resolvable:$true] %s347_s24 }
  0x55   : > { %s1479_s14 = scalar_lea.hbm %s1633_s2, %s987_s20 }
  0x56   : > { %s1165_s29 = scalar_lea.hbm %s1479_s14, 2304  ;;  %p1171_p0 = scmp.lt.u32.totalorder %s1479_s14, %s1633_s2 }
  0x57   : > { %p1166_p11 = scmp.ne.s32.totalorder %s1479_s14, %s1165_s29  ;;  %p1172_p3 = scmp.lt.u32.totalorder %s1170_s30, %s1165_s29 }
  0x58   : > { %p1174_p8 = scmp.lt.u32.totalorder %s1165_s29, %s1479_s14 }
  0x59   : > { %p1168_p7 = pnand %p1166_p11, %p1407_p4  ;;  %p1173_p5 = por %p1172_p3, %p1171_p0 }
  0x5b   : > { %p1169_p1 = pneg %p1168_p7  ;;  %p1175_p10 = por %p1174_p8, %p1173_p5 }
  0x5d   : > { %p1176_p6 = pnand %p1175_p10, %p1169_p1 }
  0x5f   : > { %1179 = shalt.err (!%p1176_p6)
}
  0x60   : > { %s1180_s16 = scalar_lea.vmem %s1474_s24, 2304  ;;  %s1271_s20 = smov [#allocation7]  }
  0x61   : > { %p1181_p9 = scmp.ne.s32.totalorder %s1474_s24, %s1180_s16  ;;  %s1185_s27 = sshll.u32 %s1271_s20, 4  ;;  %s1186_s27 = int_to_ptr.vmem [resolvable:$false] %s1185_s27 }
  0x62   : > { %s1187_s15 = scalar_lea.vmem %s1186_s27, 4608  ;;  %p1188_p11 = scmp.lt.s32.totalorder %s1474_s24, %s1186_s27 }
  0x63   : > { %p1183_p12 = pnand %p1181_p9, %p1407_p4  ;;  %p1189_p7 = scmp.lt.s32.totalorder %s1187_s15, %s1180_s16 }
  0x65   : > { %p1184_p2 = pneg %p1183_p12  ;;  %p1190_p0 = por %p1189_p7, %p1188_p11 }
  0x67   : > { %p1191_p3 = pnand %p1190_p0, %p1184_p2 }
  0x69   : > { %1194 = shalt.err (!%p1191_p3)
}
  0x6a   : > { %1008 = dma.hbm_to_vmem [thread:$0]  (!%p1381_p13), %s1479_s14, 2304, %s1474_s24, %s1401_s18, %s1268_s11, %s1268_s11, %s1269_s28  }
  0x6b   : > { %p1666_p4 = scmp.ne.s32.totalorder %s1664_s17, 0 }
  0x6c   : > { %s1509_s26 = sand.u32 (!%p1666_p4), 1, %s1257_s10   ;;  %p1667_p1 = scmp.ne.s32.totalorder (!%p1666_p4), %s1657_s19, 0 }
  0x6d   : > { %359 = sbr.rel (%p1666_p4) target bundleno = 392 (0x188), region = 56  ;;  %s362_s29 = scalar_lea.sflag (!%p1666_p4), [#allocation3], %s1509_s26 }
  0x6e   : > { %s988_s21 = smul.u32 (!%p1666_p4), 48, %s1509_s26 }
  0x70   : > { %s1513_s1 = scalar_lea.vmem (!%p1666_p4), [#allocation2], %s988_s21 }
  0x74   : > { %1240 = dma.done.wait (%p1667_p1), %s362_s29, 768  }
  0x75   : > { %1242 = vsyncadd (%p1667_p1), %s362_s29, 4294966528  ;;  %s370_s18 = sand.u32 1, %s1345_s13   ;;  %s989_s23 = smul.u32 80, %s1509_s26 }
  0x76   : > { %s371_s17 = scalar_lea.sflag [#allocation6], %s370_s18 }
  0x77   : > { %s1521_s11 = scalar_lea.vmem [#allocation5], %s989_s23 }
  0x78   : > { %1244 = dma.done.wait (%p1667_p1), %s371_s17, 3584  }
  0x79   : > { %1246 = vsyncadd (%p1667_p1), %s371_s17, 4294963712  ;;  %s990_s28 = smul.u32 144, %s1509_s26  ;;  %v1272_v0 = vmov 0   ;;  %v1052_v1 = vld [vmem:[%s1513_s1 + $0x4] ss:$8 sps:$4 sm:$0xff]   ;;  %vm472_vm0 = vcmask 392192  }
  0x7a   : > { %508 = vmatprep.mubr.bf16.mxu1 %v1272_v0  ;;  %1050 = vset.pattern.permute.xlu0 %v1272_v0  ;;  %v1056_v3 = vld [vmem:[%s1513_s1] ss:$8 sps:$4 sm:$0xff]   ;;  %v1058_v5 = vld [vmem:[%s1513_s1 + $0x14] ss:$8 sps:$4 sm:$0xff]   ;;  %v1062_v7 = vld [vmem:[%s1513_s1 + $0x10] ss:$8 sps:$4 sm:$0xff]  }
  0x7b   : > { %1051 = vset.pattern.permute.xlu1 %v1272_v0  ;;  %s1529_s24 = scalar_lea.vmem [#allocation7], %s990_s28  ;;  %476 = vmatprep.subr.bf16.mxu1 %v1052_v1  ;;  %v1064_v9 = vld [vmem:[%s1513_s1 + $0x24] ss:$8 sps:$4 sm:$0xff]   ;;  %v1068_v11 = vld [vmem:[%s1513_s1 + $0x20] ss:$8 sps:$4 sm:$0xff]   ;;  %vm752_vm1 = vcmask 130048  }
  0x7c   : > { %v1054_v2 = vld [vmem:[%s1529_s24 + $0x4] ss:$8 sps:$4 sm:$0xff]   ;;  %v1057_v4 = vld [vmem:[%s1529_s24] ss:$8 sps:$4 sm:$0xff]   ;;  %477 = vmatpush1.bf16.msra.mxu1 %v1056_v3  ;;  %v1060_v6 = vld [vmem:[%s1529_s24 + $0x14] ss:$8 sps:$4 sm:$0xff]  }
  0x7d   : > { %756 = vmatprep.subr.bf16.mxu0 %v1054_v2  ;;  %478 = vmatprep.subr.bf16.mxu1 %v1058_v5  ;;  %v1063_v8 = vld [vmem:[%s1529_s24 + $0x10] ss:$8 sps:$4 sm:$0xff]   ;;  %v1066_v10 = vld [vmem:[%s1529_s24 + $0x24] ss:$8 sps:$4 sm:$0xff]   ;;  %v1069_v12 = vld [vmem:[%s1529_s24 + $0x20] ss:$8 sps:$4 sm:$0xff]  }
  0x7e   : > { %757 = vmatpush1.bf16.msra.mxu0 %v1057_v4  ;;  %v1072_v13 = vld [vmem:[%s1521_s11 + $0x4] ss:$8 sps:$4 sm:$0xff]   ;;  %v429_v14 = vld [vmem:[%s1634_s3] sm:$0xf]  ;;  %v1073_v15 = vld [vmem:[%s1529_s24 + $0x34] ss:$8 sps:$4 sm:$0xff]  }
  0x7f   : > { %758 = vmatprep.subr.bf16.mxu0 %v1060_v6  ;;  %v1070_v16 = vld [vmem:[%s1521_s11] ss:$8 sps:$4 sm:$0xff]   ;;  %v1075_v17 = vld [vmem:[%s1529_s24 + $0x30] ss:$8 sps:$4 sm:$0xff]   ;;  %v1078_v18 = vld [vmem:[%s1521_s11 + $0x14] ss:$8 sps:$4 sm:$0xff]  }
  0x80   : > { %479 = vmatpush1.bf16.msra.mxu1 %v1062_v7  ;;  %v1079_v19 = vld [vmem:[%s1529_s24 + $0x44] ss:$8 sps:$4 sm:$0xff]   ;;  %v1076_v20 = vld [vmem:[%s1521_s11 + $0x10] ss:$8 sps:$4 sm:$0xff]   ;;  %v1081_v21 = vld [vmem:[%s1529_s24 + $0x40] ss:$8 sps:$4 sm:$0xff]  }
  0x81   : > { %480 = vmatprep.subr.bf16.mxu1 %v1064_v9  ;;  %v1084_v22 = vld [vmem:[%s1521_s11 + $0x24] ss:$8 sps:$4 sm:$0xff]   ;;  %v1085_v23 = vld [vmem:[%s1529_s24 + $0x54] ss:$8 sps:$4 sm:$0xff]   ;;  %v1082_v24 = vld [vmem:[%s1521_s11 + $0x20] ss:$8 sps:$4 sm:$0xff]  }
  0x82   : > { %759 = vmatpush1.bf16.msra.mxu0 %v1063_v8  ;;  %v1087_v25 = vld [vmem:[%s1529_s24 + $0x50] ss:$8 sps:$4 sm:$0xff]   ;;  %v1090_v26 = vld [vmem:[%s1521_s11 + $0x34] ss:$8 sps:$4 sm:$0xff]   ;;  %v1091_v27 = vld [vmem:[%s1529_s24 + $0x64] ss:$8 sps:$4 sm:$0xff]  }
  0x83   : > { %760 = vmatprep.subr.bf16.mxu0 %v1066_v10  ;;  %v631_v28 = vld [vmem:[%s1636_s5] sm:$0xff]  ;;  %vm584_vm2 = vcmask 654336   ;;  %s936_s1 = sshll.u32 %s1509_s26, 4  ;;  %s1668_s18 = sld [smem:[#allocation16_spill]] }
  0x84   : > { %481 = vmatpush1.bf16.msra.mxu1 %v1068_v11  ;;  %v436_v29 = vld [vmem:[%s1637_s6] sm:$0xff]  ;;  %v956_v32 = vcombine.high %v631_v28, %v631_v28  ;;  %v955_v42 = vcombine.low %v631_v28, %v631_v28  ;;  %s981_s23 = sshll.u32 %s1345_s13, 8  ;;  %s427_s17 = scalar_lea.vmem [#allocation8], %s936_s1 }
  0x85   : > { %588 = vmatprep.subr.bf16.mxu1 %v1072_v13  ;;  %v1088_v30 = vld [vmem:[%s1521_s11 + $0x30] ss:$8 sps:$4 sm:$0xff]   ;;  %v1093_v31 = vld [vmem:[%s1529_s24 + $0x60] ss:$8 sps:$4 sm:$0xff]   ;;  %v1096_v34 = vld [vmem:[%s1521_s11 + $0x44] ss:$8 sps:$4 sm:$0xff]   ;;  %439 = vperm.xlu0 %1050, %v436_v29  }
  0x86   : > { %761 = vmatpush1.bf16.msra.mxu0 %v1069_v12  ;;  %v650_v33 = vld [vmem:[%s1639_s8] sm:$0xff]  ;;  %975 = vmatprep.mubr.msk.bf16.mxu0 %vm752_vm1, %v956_v32  ;;  %s1669_s19 = sld [smem:[#allocation19_spill]]  ;;  %s802_s13 = scalar_lea.sflag [#allocation4], %s1509_s26 }
  0x87   : > { %762 = vmatprep.subr.bf16.mxu0 %v1073_v15  ;;  %943 = vmatmul.mubr.msk.bf16.vlgmr.msra.gmra.mrb[0].mxu1 %vm472_vm0, %v429_v14  ;;  %v1097_v35 = vld [vmem:[%s1529_s24 + $0x74] ss:$8 sps:$4 sm:$0xff]   ;;  %v1094_v37 = vld [vmem:[%s1521_s11 + $0x40] ss:$8 sps:$4 sm:$0xff]   ;;  %v1099_v38 = vld [vmem:[%s1529_s24 + $0x70] ss:$8 sps:$4 sm:$0xff]  }
  0x88   : > { %589 = vmatpush1.bf16.msra.mxu1 %v1070_v16  ;;  %620 = vmatprep.mubr.bf16.mxu1 %v1272_v0  ;;  %v528_v36 = vld [vmem:[%s1638_s7] sm:$0xff]  ;;  %s816_s11 = sshll.u32 %s427_s17, 4  ;;  %s1273_s30 = smov [#allocation8]   ;;  %s1589_s11 = int_to_ptr.vmem [resolvable:$true] %s816_s11 }
  0x89   : > { %590 = vmatprep.subr.bf16.mxu1 %v1078_v18  ;;  %653 = vperm.xlu1 %1051, %v650_v33   ;;  %v1100_v39 = vld [vmem:[%s1529_s24 + $0x84] ss:$8 sps:$4 sm:$0xff]   ;;  %v517_v40 = vld [vmem:[%s1635_s4] sm:$0xf]  ;;  %s1195_s9 = scalar_lea.vmem %s1589_s11, 256  ;;  %p1670_p5 = scmp.ne.s32.totalorder %s1668_s18, 0 }
  0x8a   : > { %763 = vmatpush1.bf16.msra.mxu0 %v1075_v17  ;;  %531 = vperm.xlu0 %1050, %v528_v36   ;;  %v1102_v41 = vld [vmem:[%s1529_s24 + $0x80] ss:$8 sps:$4 sm:$0xff]   ;;  %p1196_p13 = scmp.ne.s32.totalorder %s1589_s11, %s1195_s9  ;;  %s1199_s22 = sshll.u32 %s1273_s30, 4  ;;  %s1200_s22 = int_to_ptr.vmem [resolvable:$false] %s1199_s22 }
  0x8b   : > { %764 = vmatprep.subr.bf16.mxu0 %v1079_v19  ;;  %s1201_s25 = scalar_lea.vmem %s1200_s22, 512  ;;  %p1202_p6 = scmp.lt.s32.totalorder %s1589_s11, %s1200_s22 }
  0x8c   : > { %591 = vmatpush1.bf16.msra.mxu1 %v1076_v20  ;;  %s1587_s14 = scalar_lea.hbm %s1669_s19, %s981_s23  ;;  %p1197_p8 = pnand %p1196_p13, %p1670_p5 }
  0x8d   : > { %592 = vmatprep.subr.bf16.mxu1 %v1084_v22  ;;  %p1203_p9 = scmp.lt.s32.totalorder %s1201_s25, %s1195_s9 }
  0x8e   : > { %765 = vmatpush1.bf16.msra.mxu0 %v1081_v21  ;;  %p1198_p10 = pneg %p1197_p8 }
  0x8f   : > { %766 = vmatprep.subr.bf16.mxu0 %v1085_v23  ;;  %p1204_p12 = por %p1203_p9, %p1202_p6 }
  0x90   : > { %593 = vmatpush1.bf16.msra.mxu1 %v1082_v24 }
  0x91   : > { %594 = vmatprep.subr.bf16.mxu1 %v1090_v26  ;;  %p1205_p2 = pnand %p1204_p12, %p1198_p10 }
  0x92   : > { %767 = vmatpush1.bf16.msra.mxu0 %v1087_v25 }
  0x93   : > { %768 = vmatprep.subr.bf16.mxu0 %v1091_v27 }
  0x94   : > { %595 = vmatpush1.bf16.msra.mxu1 %v1088_v30 }
  0x95   : > { %596 = vmatprep.subr.bf16.mxu1 %v1096_v34 }
  0x96   : > { %769 = vmatpush1.bf16.msra.mxu0 %v1093_v31 }
  0x97   : > { %770 = vmatprep.subr.bf16.mxu0 %v1097_v35 }
  0x98   : > { %597 = vmatpush1.bf16.msra.mxu1 %v1094_v37 }
  0x9a   : > { %771 = vmatpush1.bf16.msra.mxu0 %v1099_v38 }
  0x9b   : > { %772 = vmatprep.subr.bf16.mxu0 %v1100_v39  ;;  %954 = vmatmul.mubr.msk.bf16.vlgmr.msra.gmra.mrb[4].mxu1 %vm584_vm2, %v517_v40 }
  0x9e   : > { %773 = vmatpush1.bf16.msra.mxu0 %v1102_v41 }
  0xa1   : > { %789 = vmatmul.mubr.bf16.vlgmr.msra.gmra.mrb[0].mxu0 %v955_v42 }
 0x104   : > { %v440_v47 = vpop.permute.xlu0 %439 }
 0x108   : > { %v654_v56 = vpop.permute.xlu1 %653 }
 0x109   : > { %v532_v48 = vpop.permute.xlu0 %531 }
 0x15a   : > { %v510_v43 = vpop.f32.mrb[0].mxu1 }
 0x15b   : > { %v512_v44 = vpop.f32.mrb[1].mxu1  ;;  %v511_v50 = vadd.f32 %v510_v43, %v440_v47 }
 0x15c   : > { %v514_v45 = vpop.f32.mrb[2].mxu1  ;;  %v513_v53 = vadd.f32 %v512_v44, %v440_v47 }
 0x15d   : > { %v515_v46 = vpop.f32.mrb[3].mxu1 }
 0x16e   : > { %v622_v49 = vpop.f32.mrb[4].mxu1 }
 0x16f   : > { %v623_v51 = vadd.f32 %v622_v49, %v532_v48  ;;  %v624_v52 = vpop.f32.mrb[5].mxu1 }
 0x170   : > { %v625_v54 = vadd.f32 %v624_v52, %v532_v48  ;;  %v626_v55 = vpop.f32.mrb[6].mxu1 }
 0x171   : > { %v629_v57 = vmul.f32 %v623_v51, %v511_v50  ;;  %v627_v58 = vpop.f32.mrb[7].mxu1 }
 0x172   : > { %v630_v59 = vmul.f32 %v625_v54, %v513_v53 }
 0x174   : > { %v790_v60 = vpop.f32.mrb[0].mxu0 }
 0x175   : > { %v791_v61 = vadd.f32 %v790_v60, %v654_v56  ;;  %v792_v62 = vpop.f32.mrb[1].mxu0 }
 0x176   : > { %v793_v63 = vadd.f32 %v792_v62, %v654_v56  ;;  %v794_v0 = vpop.f32.mrb[2].mxu0 }
 0x177   : > { %v797_v1 = vmul.f32 %v791_v61, %v629_v57  ;;  %v795_v2 = vpop.f32.mrb[3].mxu0 }
 0x178   : > { %v798_v3 = vmul.f32 %v793_v63, %v630_v59 }
 0x179   : > { %799 = vst [vmem:[%s427_s17] sm:$0xff] %v797_v1 }
 0x17a   : > { %800 = vst [vmem:[%s427_s17 + $0x8] sm:$0xff] %v798_v3 }
 0x17b   : > { %1208 = shalt.err (!%p1205_p2)
}
 0x17c   : > { %s1209_s26 = scalar_lea.hbm %s1587_s14, 256  ;;  %s1213_s27 = scalar_lea.hbm %s1669_s19, 512 }
 0x17d   : > { %p1210_p11 = scmp.ne.s32.totalorder %s1587_s14, %s1209_s26  ;;  %p1214_p3 = scmp.lt.u32.totalorder %s1587_s14, %s1669_s19 }
 0x17e   : > { %p1215_p4 = scmp.lt.u32.totalorder %s1213_s27, %s1209_s26  ;;  %p1217_p13 = scmp.lt.u32.totalorder %s1209_s26, %s1587_s14 }
 0x17f   : > { %p1211_p7 = pnand %p1210_p11, %p1670_p5 }
 0x180   : > { %p1216_p1 = por %p1215_p4, %p1214_p3 }
 0x181   : > { %p1212_p0 = pneg %p1211_p7 }
 0x182   : > { %p1218_p8 = por %p1217_p13, %p1216_p1 }
 0x184   : > { %p1219_p10 = pnand %p1218_p8, %p1212_p0 }
 0x186   : > { %1222 = shalt.err (!%p1219_p10)
}
 0x187   : > { %997 = dma.vmem_to_hbm [thread:$0]  (%p1670_p5), %s1589_s11, 256, %s1587_s14, %s802_s13  }
 0x188 PF: > { %s1671_s29 = sld [smem:[#allocation12_spill]]  ;;  %s1672_s1 = sld [smem:[#allocation17_spill]] }
 0x189   : > { %p1674_p9 = scmp.ge.s32.totalorder %s1265_s12, 2 }
 0x18e   : > { %s828_s23 = sand.u32 1, %s1671_s29   ;;  %p1673_p6 = scmp.ne.s32.totalorder %s1672_s1, 0 }
 0x18f   : > { %s829_s17 = scalar_lea.sflag [#allocation4], %s828_s23 }
 0x190   : > { %p1010_p12 = pnand %p1674_p9, %p1673_p6 }
 0x192   : > { %1248 = dma.done.wait (!%p1010_p12), %s829_s17, 256  }
 0x193   : > { %1250 = vsyncadd (!%p1010_p12), %s829_s17, 4294967040  ;;  %s1675_s12 = sld [smem:[#allocation14_spill]]  ;;  %s1676_s28 = sld [smem:[#allocation13_spill]] }
 0x194   : > { %s1677_s11 = sld [smem:[#allocation15_spill]]  ;;  %s1678_s30 = smov %s1257_s10 }
 0x199   : > { %p25_p2 = scmp.ge.s32.totalorder %s1675_s12, 4   ;;  %s1679_s10 = smov %s1676_s28 }
 0x19b   :  { %27 = sbr.rel (!%p25_p2) target bundleno = 10 (0xa), region = 125 }
 0x1a2   :  { %834 = vsyncpa [#allocation3], 1 }
 0x1a3   :  { %836 = vsyncpa [#allocation3 + $0x1], 1 }
 0x1a4   :  { %837 = vsyncpa [#allocation6], 1 }
 0x1a5   :  { %839 = vsyncpa [#allocation6 + $0x1], 1 }
 0x1a6   :  { %840 = vsyncpa [#allocation4], 1 }
 0x1a7   :  { %842 = vsyncpa [#allocation4 + $0x1], 1 }

</bundles_post_ra>
